<compile_context>
chip_gen: v5e
topology: v5e:2x2
jax: 0.10.0
libtpu: 0.0.40
codegen_flags: <defaults>
</compile_context>

<pallas_src>
import jax
import jax.numpy as jnp
from jax.experimental import pallas as pl
from jax.experimental.pallas import tpu as pltpu


def _round_up(x, m):
    return (x + m - 1) // m * m


def _gru_seq_kernel(tok_ref,    # scalar prefetch (SMEM): int32[T]
                    emb_ref,    # VMEM (Vp, Hp)   padded embedding table (resident)
                    h0_ref,     # VMEM (1, Hp)    initial hidden
                    w_ref,      # VMEM (2*Hp, 4*Hp)  repacked weights
                    b_ref,      # VMEM (1, 4*Hp)  folded biases
                    out_ref):   # VMEM (T, Hp)    per-step hidden states
    Hp = h0_ref.shape[-1]
    T = out_ref.shape[0]

    w = w_ref[...]              # hoisted: loaded once for the whole sequence
    b = b_ref[...]

    def step(t, h):             # h: (1, Hp) carried in vregs
        x = emb_ref[pl.ds(tok_ref[t], 1), :]                    # (1, Hp) row gather
        xh = jnp.concatenate([x, h], axis=1)                    # (1, 2*Hp)
        # Single MXU pass: column blocks = [gi_r+gh_r | gi_z+gh_z | gi_n | gh_n]
        g = jnp.dot(xh, w, preferred_element_type=jnp.float32) + b   # (1, 4*Hp)
        r = jax.nn.sigmoid(g[:, 0 * Hp:1 * Hp])
        z = jax.nn.sigmoid(g[:, 1 * Hp:2 * Hp])
        n = jnp.tanh(g[:, 2 * Hp:3 * Hp] + r * g[:, 3 * Hp:4 * Hp])
        h_new = (1.0 - z) * n + z * h                           # padded lanes stay 0
        out_ref[pl.ds(t, 1), :] = h_new
        return h_new

    jax.lax.fori_loop(0, T, step, h0_ref[...], unroll=True)


def pack_params(params):
    """One-time offline repack into the lane-aligned fused-gate layout.

    Returns (emb_p (Vp,Hp), w' (2Hp,4Hp), b' (1,4Hp)).  Call ONCE and reuse;
    this is intentionally outside the per-call jit.
    """
    emb, wih_t, whh_t, bih, bhh = params
    V, H = emb.shape
    Hp = _round_up(H, 128)
    Vp = _round_up(V, 8)

    emb_p = jnp.zeros((Vp, Hp), jnp.float32).at[:V, :H].set(emb.astype(jnp.float32))

    # W' row blocks: [x-rows (Hp) ; h-rows (Hp)].
    # W' col blocks: [r (ih+hh) | z (ih+hh) | n_x (ih only) | n_h (hh only)].
    w = jnp.zeros((2 * Hp, 4 * Hp), jnp.float32)
    b = jnp.zeros((1, 4 * Hp), jnp.float32)
    # reset gate
    w = w.at[0:H, 0:H].set(wih_t[:, 0:H])
    w = w.at[Hp:Hp + H, 0:H].set(whh_t[:, 0:H])
    b = b.at[0, 0:H].set(bih[0:H] + bhh[0:H])
    # update gate
    w = w.at[0:H, Hp:Hp + H].set(wih_t[:, H:2 * H])
    w = w.at[Hp:Hp + H, Hp:Hp + H].set(whh_t[:, H:2 * H])
    b = b.at[0, Hp:Hp + H].set(bih[H:2 * H] + bhh[H:2 * H])
    # new gate, x contribution (gi_n)
    w = w.at[0:H, 2 * Hp:2 * Hp + H].set(wih_t[:, 2 * H:3 * H])
    b = b.at[0, 2 * Hp:2 * Hp + H].set(bih[2 * H:3 * H])
    # new gate, h contribution (gh_n)
    w = w.at[Hp:Hp + H, 3 * Hp:3 * Hp + H].set(whh_t[:, 2 * H:3 * H])
    b = b.at[0, 3 * Hp:3 * Hp + H].set(bhh[2 * H:3 * H])
    return emb_p, w, b


@jax.jit
def encoder_forward(tokens, hidden, emb_p, w_pack, b_pack):
    """tokens: int32[T] (T=1 == the PyTorch forward); hidden: f32[1,1,H].
    Returns (output f32[T,1,H], new_hidden f32[1,1,H])."""
    H = hidden.shape[-1]
    Vp, Hp = emb_p.shape
    T = tokens.shape[0]

    # Clamp token ids: an OOB row read in VMEM is not a safe failure mode on TPU.
    tok = jnp.clip(tokens.astype(jnp.int32).reshape(T), 0, Vp - 1)
    # Invariant: padded lanes of h0 must be zero (they then stay zero in-kernel).
    h0 = jnp.zeros((1, Hp), jnp.float32).at[:, :H].set(
        hidden.reshape(1, H).astype(jnp.float32))

    out = pl.pallas_call(
        _gru_seq_kernel,
        out_shape=jax.ShapeDtypeStruct((T, Hp), jnp.float32),
        grid_spec=pltpu.PrefetchScalarGridSpec(
            num_scalar_prefetch=1,
            grid=(1,),   # single grid step; the time loop runs inside the kernel
            in_specs=[
                pl.BlockSpec((Vp, Hp), lambda i, tok: (0, 0)),            # embedding table
                pl.BlockSpec((1, Hp), lambda i, tok: (0, 0)),             # initial hidden
                pl.BlockSpec((2 * Hp, 4 * Hp), lambda i, tok: (0, 0)),    # packed weights
                pl.BlockSpec((1, 4 * Hp), lambda i, tok: (0, 0)),         # packed biases
            ],
            out_specs=pl.BlockSpec((T, Hp), lambda i, tok: (0, 0)),       # one writeback
        ),
        compiler_params=pltpu.CompilerParams(dimension_semantics=("arbitrary",)),
    )(tok, emb_p, h0, w_pack, b_pack)

    outputs = out[:, :H].reshape(T, 1, H)
    new_hidden = out[T - 1, :H].reshape(1, 1, H)
    return outputs, new_hidden


def init_params(key, input_size, hidden_size):
    """Deterministic synthetic parameters matching nn.Embedding + nn.GRU shapes."""
    H = hidden_size
    k = 1.0 / jnp.sqrt(H)
    ks = jax.random.split(key, 5)
    emb = jax.random.normal(ks[0], (input_size, H), jnp.float32)
    # PyTorch stores weight_ih_l0 / weight_hh_l0 as (3H, H); we keep the transpose (H, 3H).
    wih_t = jax.random.uniform(ks[1], (H, 3 * H), jnp.float32, -k, k)
    whh_t = jax.random.uniform(ks[2], (H, 3 * H), jnp.float32, -k, k)
    bih = jax.random.uniform(ks[3], (3 * H,), jnp.float32, -k, k)
    bhh = jax.random.uniform(ks[4], (3 * H,), jnp.float32, -k, k)
    return emb, wih_t, whh_t, bih, bhh


def _gru_step_ref(x, h, params):
    _, wih_t, whh_t, bih, bhh = params
    H = h.shape[-1]
    gi = x @ wih_t + bih
    gh = h @ whh_t + bhh
    r = jax.nn.sigmoid(gi[:, :H] + gh[:, :H])
    z = jax.nn.sigmoid(gi[:, H:2 * H] + gh[:, H:2 * H])
    n = jnp.tanh(gi[:, 2 * H:] + r * gh[:, 2 * H:])
    return (1.0 - z) * n + z * h


def encoder_forward_ref(tokens, hidden, params):
    """Pure-JAX reference (PyTorch GRU semantics), for verification."""
    emb = params[0]
    H = hidden.shape[-1]
    h = hidden.reshape(1, H)
    outs = []
    for t in range(tokens.shape[0]):
        x = emb[tokens[t]].reshape(1, H)
        h = _gru_step_ref(x, h, params)
        outs.append(h)
    out = jnp.stack(outs, axis=0).reshape(-1, 1, H)
    return out, h.reshape(1, 1, H)


if __name__ == "__main__":
    INPUT_SIZE = 16   # vocab size
    HIDDEN = 32

    key = jax.random.PRNGKey(0)
    pkey, tkey1, tkey2 = jax.random.split(key, 3)
    params = init_params(pkey, INPUT_SIZE, HIDDEN)
    emb_p, w_pack, b_pack = pack_params(params)       # packed ONCE, reused per call
    hidden0 = jnp.zeros((1, 1, HIDDEN), jnp.float32)  # Encoder.initHidden equivalent

    # 1) Single-step call: exactly the PyTorch Encoder.forward(x, hidden) semantics.
    token = jax.random.randint(tkey1, (1,), 0, INPUT_SIZE, dtype=jnp.int32)
    out, new_hidden = encoder_forward(token, hidden0, emb_p, w_pack, b_pack)
    out = jax.block_until_ready(out)
    new_hidden = jax.block_until_ready(new_hidden)
    ref_out, ref_hidden = encoder_forward_ref(token, hidden0, params)
    assert out.shape == (1, 1, HIDDEN) and new_hidden.shape == (1, 1, HIDDEN)
    assert jnp.allclose(out, ref_out, atol=1e-5), "single-step output mismatch"
    assert jnp.allclose(new_hidden, ref_hidden, atol=1e-5), "single-step hidden mismatch"

    # 2) Multi-step: the in-kernel time loop carries hidden in vregs,
    #    weights/embedding are DMA'd once for the whole sequence.
    T = 8
    tokens = jax.random.randint(tkey2, (T,), 0, INPUT_SIZE, dtype=jnp.int32)
    out_seq, hid_seq = encoder_forward(tokens, hidden0, emb_p, w_pack, b_pack)
    out_seq = jax.block_until_ready(out_seq)
    hid_seq = jax.block_until_ready(hid_seq)
    ref_seq, ref_hid = encoder_forward_ref(tokens, hidden0, params)
    assert out_seq.shape == (T, 1, HIDDEN)
    assert jnp.allclose(out_seq, ref_seq, atol=1e-4), "sequence output mismatch"
    assert jnp.allclose(hid_seq, ref_hid, atol=1e-4), "sequence hidden mismatch"

    print("KERNEL_OK")
</pallas_src>

<mosaic_0001>
module attributes {stable_mosaic.version = 11 : i64} {
  func.func @_gru_seq_kernel(%arg0: i32, %arg1: memref<1xi32, #tpu.memory_space<smem>>, %arg2: memref<16x128xf32, #tpu.memory_space<vmem>>, %arg3: memref<1x128xf32, #tpu.memory_space<vmem>>, %arg4: memref<256x512xf32, #tpu.memory_space<vmem>>, %arg5: memref<1x512xf32, #tpu.memory_space<vmem>>, %arg6: memref<1x128xf32, #tpu.memory_space<vmem>>) attributes {dimension_semantics = [#tpu.dimension_semantics<arbitrary>], iteration_bounds = array<i64: 1>, scalar_prefetch = 1 : i64, scratch_operands = 0 : i64, tpu.core_type = #tpu.core_type<tc>, window_params = [{pipeline_mode = #tpu.pipeline_mode<synchronous>, transform_indices = @transform_0, window_bounds = array<i64: 16, 128>}, {pipeline_mode = #tpu.pipeline_mode<synchronous>, transform_indices = @transform_1, window_bounds = array<i64: 1, 128>}, {pipeline_mode = #tpu.pipeline_mode<synchronous>, transform_indices = @transform_2, window_bounds = array<i64: 256, 512>}, {pipeline_mode = #tpu.pipeline_mode<synchronous>, transform_indices = @transform_3, window_bounds = array<i64: 1, 512>}, {pipeline_mode = #tpu.pipeline_mode<synchronous>, transform_indices = @transform_4, window_bounds = array<i64: 1, 128>}]} {
    %c0 = arith.constant 0 : index
    %c0_0 = arith.constant 0 : index
    %0 = vector.load %arg4[%c0, %c0_0] : memref<256x512xf32, #tpu.memory_space<vmem>>, vector<256x512xf32>
    %c0_1 = arith.constant 0 : index
    %c0_2 = arith.constant 0 : index
    %1 = vector.load %arg5[%c0_1, %c0_2] : memref<1x512xf32, #tpu.memory_space<vmem>>, vector<1x512xf32>
    %c0_3 = arith.constant 0 : index
    %c0_4 = arith.constant 0 : index
    %2 = vector.load %arg3[%c0_3, %c0_4] : memref<1x128xf32, #tpu.memory_space<vmem>>, vector<1x128xf32>
    %c0_i32 = arith.constant 0 : i32
    %3 = arith.index_cast %c0_i32 : i32 to index
    %4 = memref.load %arg1[%3] : memref<1xi32, #tpu.memory_space<smem>>
    %5 = arith.index_cast %4 : i32 to index
    %c0_5 = arith.constant 0 : index
    %6 = vector.load %arg2[%5, %c0_5] : memref<16x128xf32, #tpu.memory_space<vmem>>, vector<1x128xf32>
    %7 = tpu.concatenate %6, %2 in 1 : vector<1x128xf32>, vector<1x128xf32> -> vector<1x256xf32>
    %cst = arith.constant dense<0.000000e+00> : vector<1x512xf32>
    %8 = tpu.matmul %7, %0, %cst {dimension_numbers = #tpu.dot_dimension_numbers<[1], [0], [0], [1], [0, 0, 1, 1], [], []>} : vector<1x256xf32>, vector<256x512xf32>, vector<1x512xf32> -> vector<1x512xf32>
    %9 = arith.addf %8, %1 : vector<1x512xf32>
    %10 = vector.extract_strided_slice %9 {offsets = [0, 0], sizes = [1, 128], strides = [1, 1]} : vector<1x512xf32> to vector<1x128xf32>
    %11 = arith.negf %10 : vector<1x128xf32>
    %12 = math.exp %11 : vector<1x128xf32>
    %cst_6 = arith.constant 1.000000e+00 : f32
    %13 = vector.broadcast %cst_6 : f32 to vector<1x128xf32>
    %14 = arith.addf %13, %12 : vector<1x128xf32>
    %15 = arith.divf %13, %14 : vector<1x128xf32>
    %16 = vector.extract_strided_slice %9 {offsets = [0, 128], sizes = [1, 128], strides = [1, 1]} : vector<1x512xf32> to vector<1x128xf32>
    %17 = arith.negf %16 : vector<1x128xf32>
    %18 = math.exp %17 : vector<1x128xf32>
    %cst_7 = arith.constant 1.000000e+00 : f32
    %19 = vector.broadcast %cst_7 : f32 to vector<1x128xf32>
    %20 = arith.addf %19, %18 : vector<1x128xf32>
    %21 = arith.divf %19, %20 : vector<1x128xf32>
    %22 = vector.extract_strided_slice %9 {offsets = [0, 256], sizes = [1, 128], strides = [1, 1]} : vector<1x512xf32> to vector<1x128xf32>
    %23 = vector.extract_strided_slice %9 {offsets = [0, 384], sizes = [1, 128], strides = [1, 1]} : vector<1x512xf32> to vector<1x128xf32>
    %24 = arith.mulf %15, %23 : vector<1x128xf32>
    %25 = arith.addf %22, %24 : vector<1x128xf32>
    %26 = math.tanh %25 : vector<1x128xf32>
    %cst_8 = arith.constant 1.000000e+00 : f32
    %27 = vector.broadcast %cst_8 : f32 to vector<1x128xf32>
    %28 = arith.subf %27, %21 : vector<1x128xf32>
    %29 = arith.mulf %28, %26 : vector<1x128xf32>
    %30 = arith.mulf %21, %2 : vector<1x128xf32>
    %31 = arith.addf %29, %30 : vector<1x128xf32>
    %32 = arith.index_cast %c0_i32 : i32 to index
    %c0_9 = arith.constant 0 : index
    %33 = vector.load %arg6[%32, %c0_9] : memref<1x128xf32, #tpu.memory_space<vmem>>, vector<1x128xf32>
    tpu.vector_store %arg6[%32, %c0_9], %31 {strides = array<i32>} : memref<1x128xf32, #tpu.memory_space<vmem>>, vector<1x128xf32>,
    %c1_i32 = arith.constant 1 : i32
    return
  }
  func.func @transform_0(%arg0: i32, %arg1: memref<1xi32, #tpu.memory_space<smem>>) -> (i32, i32) {
    %c0_i32 = arith.constant 0 : i32
    %c0_i32_0 = arith.constant 0 : i32
    %c0_i32_1 = arith.constant 0 : i32
    return %c0_i32, %c0_i32_0 : i32, i32
  }
  func.func @transform_1(%arg0: i32, %arg1: memref<1xi32, #tpu.memory_space<smem>>) -> (i32, i32) {
    %c0_i32 = arith.constant 0 : i32
    %c0_i32_0 = arith.constant 0 : i32
    %c0_i32_1 = arith.constant 0 : i32
    return %c0_i32, %c0_i32_0 : i32, i32
  }
  func.func @transform_2(%arg0: i32, %arg1: memref<1xi32, #tpu.memory_space<smem>>) -> (i32, i32) {
    %c0_i32 = arith.constant 0 : i32
    %c0_i32_0 = arith.constant 0 : i32
    %c0_i32_1 = arith.constant 0 : i32
    return %c0_i32, %c0_i32_0 : i32, i32
  }
  func.func @transform_3(%arg0: i32, %arg1: memref<1xi32, #tpu.memory_space<smem>>) -> (i32, i32) {
    %c0_i32 = arith.constant 0 : i32
    %c0_i32_0 = arith.constant 0 : i32
    %c0_i32_1 = arith.constant 0 : i32
    return %c0_i32, %c0_i32_0 : i32, i32
  }
  func.func @transform_4(%arg0: i32, %arg1: memref<1xi32, #tpu.memory_space<smem>>) -> (i32, i32) {
    %c0_i32 = arith.constant 0 : i32
    %c0_i32_0 = arith.constant 0 : i32
    %c0_i32_1 = arith.constant 0 : i32
    return %c0_i32, %c0_i32_0 : i32, i32
  }
}

</mosaic_0001>

<bundles_post_ra>
// kernel: encoder_forward.1
= control target key start
LH: loop header
LB: loop body
LE: loop exit
PB: predicated region body
PF: predicated region fallthrough
CT: control target
= control target key end

     0   :  { %11 = vsyncpa [#allocation5], 0  ;;  %s543_s0 = inlined_call_operand.<no memory space> [shape: s32[1], index: 0, kind: input, shape index: {}]   ;;  %s544_s1 = inlined_call_operand.hbm [shape: f32[16,128], index: 1, kind: input, shape index: {}]   ;;  %s545_s2 = inlined_call_operand.vmem [shape: f32[1,128], index: 2, kind: input, shape index: {}]   ;;  %s546_s3 = inlined_call_operand.hbm [shape: f32[256,512], index: 3, kind: input, shape index: {}]   ;;  %s547_s4 = inlined_call_operand.vmem [shape: f32[1,512], index: 4, kind: input, shape index: {}]   ;;  %s548_s5 = inlined_call_operand.vmem [shape: f32[1,128], index: 5, kind: output, shape index: {}]  }
   0x1   :  { %s17_s20 = sshll.u32 %s544_s1, 4  ;;  %s18_s20 = int_to_ptr.hbm [resolvable:$true] %s17_s20 }
   0x2   :  { %12 = vsyncpa [#allocation7], 0  ;;  %s476_s21 = smov [#allocation4]   ;;  %s32_s25 = sshll.u32 %s546_s3, 4  ;;  %s33_s25 = int_to_ptr.hbm [resolvable:$true] %s32_s25 }
   0x3   :  { %s19_s22 = sshll.u32 %s476_s21, 4  ;;  %s477_s26 = smov 128   ;;  %s20_s22 = int_to_ptr.vmem [resolvable:$true] %s19_s22 }
   0x4   :  { %s478_s27 = smov 8   ;;  %s479_s28 = smov [#allocation6]  }
   0x5   :  { %25 = dma.hbm_to_vmem [thread:$0]  %s18_s20, 256, %s20_s22, [#allocation5], %s477_s26, %s477_s26, %s478_s27  }
   0x6   :  { %s34_s29 = sshll.u32 %s479_s28, 4  ;;  %s480_s30 = smov 512   ;;  %s35_s29 = int_to_ptr.vmem [resolvable:$true] %s34_s29 }
   0x7   :  { %s481_s6 = smov 32  }
   0x8   :  { %40 = dma.hbm_to_vmem [thread:$0]  %s33_s25, 16384, %s35_s29, [#allocation7], %s480_s30, %s480_s30, %s481_s6  }
   0x9   :  { %472 = dma.done.wait [#allocation5], 256  }
   0xa   :  { %473 = vsyncadd [#allocation5], 4294967040 }
   0xb   :  { %474 = dma.done.wait [#allocation7], 16384  }
   0xc   :  { %475 = vsyncadd [#allocation7], 4294950912  ;;  %v111_v0 = vld [vmem:[#allocation6 + $0x1e0] sm:$0xff]  ;;  %v112_v1 = vld [vmem:[#allocation6 + $0x1e8] sm:$0xff]  ;;  %s182_s7 = scalar_lea.vmem [#allocation4], %s543_s0 }
   0xd   :  { %v107_v2 = vld [vmem:[#allocation6 + $0x1c0] sm:$0xff]  ;;  %193 = vmatpush.msra.mxu0 %v111_v0  ;;  %233 = vmatpush.msra.mxu2 %v112_v1  ;;  %v108_v4 = vld [vmem:[#allocation6 + $0x1c8] sm:$0xff]  ;;  %v521_v62 = vld [vmem:[%s182_s7] sm:$0x1] }
   0xe   :  { %v175_v3 = vld [vmem:[#allocation6 + $0x3e0] sm:$0xff]  ;;  %v176_v5 = vld [vmem:[#allocation6 + $0x3e8] sm:$0xff]  ;;  %v114_v63 = vld [vmem:[#allocation6 + $0x1f8] sm:$0xff] }
   0xf   :  { %213 = vmatpush.msra.mxu1 %v175_v3  ;;  %253 = vmatpush.msra.mxu3 %v176_v5  ;;  %v103_v6 = vld [vmem:[#allocation6 + $0x1a0] sm:$0xff]  ;;  %v104_v8 = vld [vmem:[#allocation6 + $0x1a8] sm:$0xff]  ;;  %v110_v3 = vld [vmem:[#allocation6 + $0x1d8] sm:$0xff] }
  0x10   :  { %v171_v7 = vld [vmem:[#allocation6 + $0x3c0] sm:$0xff]  ;;  %194 = vmatpush.msra.mxu0 %v107_v2  ;;  %234 = vmatpush.msra.mxu2 %v108_v4  ;;  %v172_v9 = vld [vmem:[#allocation6 + $0x3c8] sm:$0xff]  ;;  %v526_v2 = vld [vmem:[%s545_s2] sm:$0x1] }
  0x11   :  { %v167_v10 = vld [vmem:[#allocation6 + $0x3a0] sm:$0xff]  ;;  %214 = vmatpush.msra.mxu1 %v171_v7  ;;  %254 = vmatpush.msra.mxu3 %v172_v9  ;;  %v100_v12 = vld [vmem:[#allocation6 + $0x188] sm:$0xff]  ;;  %v178_v4 = vld [vmem:[#allocation6 + $0x3f8] sm:$0xff] }
  0x12   :  { %v99_v11 = vld [vmem:[#allocation6 + $0x180] sm:$0xff]  ;;  %v168_v13 = vld [vmem:[#allocation6 + $0x3a8] sm:$0xff]  ;;  %195 = vmatpush.msra.mxu0 %v103_v6  ;;  %235 = vmatpush.msra.mxu2 %v104_v8  ;;  %v113_v5 = vld [vmem:[#allocation6 + $0x1f0] sm:$0xff] }
  0x13   :  { %v163_v14 = vld [vmem:[#allocation6 + $0x380] sm:$0xff]  ;;  %v164_v15 = vld [vmem:[#allocation6 + $0x388] sm:$0xff]  ;;  %215 = vmatpush.msra.mxu1 %v167_v10  ;;  %255 = vmatpush.msra.mxu3 %v168_v13  ;;  %v106_v6 = vld [vmem:[#allocation6 + $0x1b8] sm:$0xff] }
  0x14   :  { %v95_v16 = vld [vmem:[#allocation6 + $0x160] sm:$0xff]  ;;  %v96_v17 = vld [vmem:[#allocation6 + $0x168] sm:$0xff]  ;;  %196 = vmatpush.msra.mxu0 %v99_v11  ;;  %236 = vmatpush.msra.mxu2 %v100_v12  ;;  %v177_v7 = vld [vmem:[#allocation6 + $0x3f0] sm:$0xff] }
  0x15   :  { %v159_v18 = vld [vmem:[#allocation6 + $0x360] sm:$0xff]  ;;  %v160_v19 = vld [vmem:[#allocation6 + $0x368] sm:$0xff]  ;;  %216 = vmatpush.msra.mxu1 %v163_v14  ;;  %256 = vmatpush.msra.mxu3 %v164_v15  ;;  %v174_v8 = vld [vmem:[#allocation6 + $0x3d8] sm:$0xff] }
  0x16   :  { %v91_v20 = vld [vmem:[#allocation6 + $0x140] sm:$0xff]  ;;  %v92_v21 = vld [vmem:[#allocation6 + $0x148] sm:$0xff]  ;;  %197 = vmatpush.msra.mxu0 %v95_v16  ;;  %237 = vmatpush.msra.mxu2 %v96_v17  ;;  %v109_v9 = vld [vmem:[#allocation6 + $0x1d0] sm:$0xff] }
  0x17   :  { %v155_v22 = vld [vmem:[#allocation6 + $0x340] sm:$0xff]  ;;  %v156_v23 = vld [vmem:[#allocation6 + $0x348] sm:$0xff]  ;;  %217 = vmatpush.msra.mxu1 %v159_v18  ;;  %257 = vmatpush.msra.mxu3 %v160_v19  ;;  %v102_v10 = vld [vmem:[#allocation6 + $0x198] sm:$0xff] }
  0x18   :  { %v87_v24 = vld [vmem:[#allocation6 + $0x120] sm:$0xff]  ;;  %v88_v25 = vld [vmem:[#allocation6 + $0x128] sm:$0xff]  ;;  %198 = vmatpush.msra.mxu0 %v91_v20  ;;  %238 = vmatpush.msra.mxu2 %v92_v21  ;;  %v173_v11 = vld [vmem:[#allocation6 + $0x3d0] sm:$0xff] }
  0x19   :  { %v151_v26 = vld [vmem:[#allocation6 + $0x320] sm:$0xff]  ;;  %v152_v27 = vld [vmem:[#allocation6 + $0x328] sm:$0xff]  ;;  %218 = vmatpush.msra.mxu1 %v155_v22  ;;  %258 = vmatpush.msra.mxu3 %v156_v23  ;;  %v170_v12 = vld [vmem:[#allocation6 + $0x3b8] sm:$0xff] }
  0x1a   :  { %v83_v28 = vld [vmem:[#allocation6 + $0x100] sm:$0xff]  ;;  %v84_v29 = vld [vmem:[#allocation6 + $0x108] sm:$0xff]  ;;  %199 = vmatpush.msra.mxu0 %v87_v24  ;;  %239 = vmatpush.msra.mxu2 %v88_v25  ;;  %v105_v13 = vld [vmem:[#allocation6 + $0x1b0] sm:$0xff] }
  0x1b   :  { %v147_v30 = vld [vmem:[#allocation6 + $0x300] sm:$0xff]  ;;  %v148_v31 = vld [vmem:[#allocation6 + $0x308] sm:$0xff]  ;;  %219 = vmatpush.msra.mxu1 %v151_v26  ;;  %259 = vmatpush.msra.mxu3 %v152_v27  ;;  %v98_v14 = vld [vmem:[#allocation6 + $0x178] sm:$0xff] }
  0x1c   :  { %v79_v32 = vld [vmem:[#allocation6 + $0xe0] sm:$0xff]  ;;  %v80_v33 = vld [vmem:[#allocation6 + $0xe8] sm:$0xff]  ;;  %200 = vmatpush.msra.mxu0 %v83_v28  ;;  %240 = vmatpush.msra.mxu2 %v84_v29  ;;  %v169_v15 = vld [vmem:[#allocation6 + $0x3b0] sm:$0xff] }
  0x1d   :  { %v143_v34 = vld [vmem:[#allocation6 + $0x2e0] sm:$0xff]  ;;  %v144_v35 = vld [vmem:[#allocation6 + $0x2e8] sm:$0xff]  ;;  %220 = vmatpush.msra.mxu1 %v147_v30  ;;  %260 = vmatpush.msra.mxu3 %v148_v31  ;;  %v166_v16 = vld [vmem:[#allocation6 + $0x398] sm:$0xff] }
  0x1e   :  { %v75_v36 = vld [vmem:[#allocation6 + $0xc0] sm:$0xff]  ;;  %v76_v37 = vld [vmem:[#allocation6 + $0xc8] sm:$0xff]  ;;  %201 = vmatpush.msra.mxu0 %v79_v32  ;;  %241 = vmatpush.msra.mxu2 %v80_v33  ;;  %v101_v17 = vld [vmem:[#allocation6 + $0x190] sm:$0xff] }
  0x1f   :  { %v139_v38 = vld [vmem:[#allocation6 + $0x2c0] sm:$0xff]  ;;  %v140_v39 = vld [vmem:[#allocation6 + $0x2c8] sm:$0xff]  ;;  %221 = vmatpush.msra.mxu1 %v143_v34  ;;  %261 = vmatpush.msra.mxu3 %v144_v35  ;;  %v94_v18 = vld [vmem:[#allocation6 + $0x158] sm:$0xff] }
  0x20   :  { %v71_v40 = vld [vmem:[#allocation6 + $0xa0] sm:$0xff]  ;;  %v72_v41 = vld [vmem:[#allocation6 + $0xa8] sm:$0xff]  ;;  %202 = vmatpush.msra.mxu0 %v75_v36  ;;  %242 = vmatpush.msra.mxu2 %v76_v37  ;;  %v165_v19 = vld [vmem:[#allocation6 + $0x390] sm:$0xff] }
  0x21   :  { %v135_v42 = vld [vmem:[#allocation6 + $0x2a0] sm:$0xff]  ;;  %v136_v43 = vld [vmem:[#allocation6 + $0x2a8] sm:$0xff]  ;;  %222 = vmatpush.msra.mxu1 %v139_v38  ;;  %262 = vmatpush.msra.mxu3 %v140_v39  ;;  %v162_v20 = vld [vmem:[#allocation6 + $0x378] sm:$0xff] }
  0x22   :  { %v67_v44 = vld [vmem:[#allocation6 + $0x80] sm:$0xff]  ;;  %v68_v45 = vld [vmem:[#allocation6 + $0x88] sm:$0xff]  ;;  %203 = vmatpush.msra.mxu0 %v71_v40  ;;  %243 = vmatpush.msra.mxu2 %v72_v41  ;;  %v97_v21 = vld [vmem:[#allocation6 + $0x170] sm:$0xff] }
  0x23   :  { %v131_v46 = vld [vmem:[#allocation6 + $0x280] sm:$0xff]  ;;  %v132_v47 = vld [vmem:[#allocation6 + $0x288] sm:$0xff]  ;;  %223 = vmatpush.msra.mxu1 %v135_v42  ;;  %263 = vmatpush.msra.mxu3 %v136_v43  ;;  %v90_v22 = vld [vmem:[#allocation6 + $0x138] sm:$0xff] }
  0x24   :  { %v63_v48 = vld [vmem:[#allocation6 + $0x60] sm:$0xff]  ;;  %v64_v49 = vld [vmem:[#allocation6 + $0x68] sm:$0xff]  ;;  %204 = vmatpush.msra.mxu0 %v67_v44  ;;  %244 = vmatpush.msra.mxu2 %v68_v45  ;;  %v161_v23 = vld [vmem:[#allocation6 + $0x370] sm:$0xff] }
  0x25   :  { %v127_v50 = vld [vmem:[#allocation6 + $0x260] sm:$0xff]  ;;  %v128_v51 = vld [vmem:[#allocation6 + $0x268] sm:$0xff]  ;;  %224 = vmatpush.msra.mxu1 %v131_v46  ;;  %264 = vmatpush.msra.mxu3 %v132_v47  ;;  %v158_v24 = vld [vmem:[#allocation6 + $0x358] sm:$0xff] }
  0x26   :  { %v59_v52 = vld [vmem:[#allocation6 + $0x40] sm:$0xff]  ;;  %v60_v53 = vld [vmem:[#allocation6 + $0x48] sm:$0xff]  ;;  %205 = vmatpush.msra.mxu0 %v63_v48  ;;  %245 = vmatpush.msra.mxu2 %v64_v49  ;;  %v93_v25 = vld [vmem:[#allocation6 + $0x150] sm:$0xff] }
  0x27   :  { %v123_v54 = vld [vmem:[#allocation6 + $0x240] sm:$0xff]  ;;  %v124_v55 = vld [vmem:[#allocation6 + $0x248] sm:$0xff]  ;;  %225 = vmatpush.msra.mxu1 %v127_v50  ;;  %265 = vmatpush.msra.mxu3 %v128_v51  ;;  %v86_v26 = vld [vmem:[#allocation6 + $0x118] sm:$0xff] }
  0x28   :  { %v55_v56 = vld [vmem:[#allocation6 + $0x20] sm:$0xff]  ;;  %v56_v57 = vld [vmem:[#allocation6 + $0x28] sm:$0xff]  ;;  %206 = vmatpush.msra.mxu0 %v59_v52  ;;  %246 = vmatpush.msra.mxu2 %v60_v53  ;;  %v157_v27 = vld [vmem:[#allocation6 + $0x350] sm:$0xff] }
  0x29   :  { %v119_v58 = vld [vmem:[#allocation6 + $0x220] sm:$0xff]  ;;  %v120_v59 = vld [vmem:[#allocation6 + $0x228] sm:$0xff]  ;;  %226 = vmatpush.msra.mxu1 %v123_v54  ;;  %266 = vmatpush.msra.mxu3 %v124_v55  ;;  %v154_v28 = vld [vmem:[#allocation6 + $0x338] sm:$0xff] }
  0x2a   :  { %v51_v60 = vld [vmem:[#allocation6] sm:$0xff]  ;;  %v52_v61 = vld [vmem:[#allocation6 + $0x8] sm:$0xff]  ;;  %207 = vmatpush.msra.mxu0 %v55_v56  ;;  %247 = vmatpush.msra.mxu2 %v56_v57  ;;  %v89_v29 = vld [vmem:[#allocation6 + $0x130] sm:$0xff] }
  0x2b   :  { %227 = vmatpush.msra.mxu1 %v119_v58  ;;  %267 = vmatpush.msra.mxu3 %v120_v59  ;;  %v115_v0 = vld [vmem:[#allocation6 + $0x200] sm:$0xff]  ;;  %v116_v1 = vld [vmem:[#allocation6 + $0x208] sm:$0xff]  ;;  %v82_v30 = vld [vmem:[#allocation6 + $0xf8] sm:$0xff] }
  0x2c   :  { %208 = vmatpush.msra.mxu0 %v51_v60  ;;  %248 = vmatpush.msra.mxu2 %v52_v61  ;;  %v153_v31 = vld [vmem:[#allocation6 + $0x330] sm:$0xff]  ;;  %v150_v32 = vld [vmem:[#allocation6 + $0x318] sm:$0xff] }
  0x2d   :  { %209 = vmatmul.f32.vlgmr.msra.gmra.mxu0 %v521_v62  ;;  %249 = vmatmul.f32.vlgmr.msra.gmra.mxu2 %v521_v62  ;;  %v85_v33 = vld [vmem:[#allocation6 + $0x110] sm:$0xff]  ;;  %v78_v34 = vld [vmem:[#allocation6 + $0xd8] sm:$0xff] }
  0x2e   :  { %313 = vmatpush.msrb.mxu2 %v114_v63  ;;  %228 = vmatpush.msra.mxu1 %v115_v0  ;;  %v149_v35 = vld [vmem:[#allocation6 + $0x310] sm:$0xff]  ;;  %v146_v36 = vld [vmem:[#allocation6 + $0x2f8] sm:$0xff] }
  0x2f   :  { %268 = vmatpush.msra.mxu3 %v116_v1  ;;  %229 = vmatmul.f32.vlgmr.msra.gmra.mxu1 %v526_v2  ;;  %v81_v37 = vld [vmem:[#allocation6 + $0xf0] sm:$0xff]  ;;  %v74_v38 = vld [vmem:[#allocation6 + $0xb8] sm:$0xff] }
  0x30   :  { %269 = vmatmul.f32.vlgmr.msra.gmra.mxu3 %v526_v2  ;;  %314 = vmatpush.msrb.mxu2 %v110_v3  ;;  %v145_v39 = vld [vmem:[#allocation6 + $0x2f0] sm:$0xff]  ;;  %v142_v40 = vld [vmem:[#allocation6 + $0x2d8] sm:$0xff] }
  0x31   :  { %333 = vmatpush.msrb.mxu3 %v178_v4  ;;  %273 = vmatpush.msrb.mxu0 %v113_v5  ;;  %v77_v41 = vld [vmem:[#allocation6 + $0xd0] sm:$0xff]  ;;  %v70_v42 = vld [vmem:[#allocation6 + $0x98] sm:$0xff] }
  0x32   :  { %315 = vmatpush.msrb.mxu2 %v106_v6  ;;  %293 = vmatpush.msrb.mxu1 %v177_v7  ;;  %v141_v43 = vld [vmem:[#allocation6 + $0x2d0] sm:$0xff]  ;;  %v138_v44 = vld [vmem:[#allocation6 + $0x2b8] sm:$0xff] }
  0x33   :  { %334 = vmatpush.msrb.mxu3 %v174_v8  ;;  %274 = vmatpush.msrb.mxu0 %v109_v9  ;;  %v73_v45 = vld [vmem:[#allocation6 + $0xb0] sm:$0xff]  ;;  %v66_v46 = vld [vmem:[#allocation6 + $0x78] sm:$0xff] }
  0x34   :  { %316 = vmatpush.msrb.mxu2 %v102_v10  ;;  %294 = vmatpush.msrb.mxu1 %v173_v11  ;;  %v137_v47 = vld [vmem:[#allocation6 + $0x2b0] sm:$0xff]  ;;  %v134_v48 = vld [vmem:[#allocation6 + $0x298] sm:$0xff] }
  0x35   :  { %335 = vmatpush.msrb.mxu3 %v170_v12  ;;  %275 = vmatpush.msrb.mxu0 %v105_v13  ;;  %v69_v49 = vld [vmem:[#allocation6 + $0x90] sm:$0xff]  ;;  %v62_v50 = vld [vmem:[#allocation6 + $0x58] sm:$0xff] }
  0x36   :  { %317 = vmatpush.msrb.mxu2 %v98_v14  ;;  %295 = vmatpush.msrb.mxu1 %v169_v15  ;;  %v133_v51 = vld [vmem:[#allocation6 + $0x290] sm:$0xff]  ;;  %v130_v52 = vld [vmem:[#allocation6 + $0x278] sm:$0xff] }
  0x37   :  { %336 = vmatpush.msrb.mxu3 %v166_v16  ;;  %276 = vmatpush.msrb.mxu0 %v101_v17  ;;  %v65_v53 = vld [vmem:[#allocation6 + $0x70] sm:$0xff]  ;;  %v58_v54 = vld [vmem:[#allocation6 + $0x38] sm:$0xff] }
  0x38   :  { %318 = vmatpush.msrb.mxu2 %v94_v18  ;;  %296 = vmatpush.msrb.mxu1 %v165_v19  ;;  %v129_v55 = vld [vmem:[#allocation6 + $0x270] sm:$0xff]  ;;  %v126_v56 = vld [vmem:[#allocation6 + $0x258] sm:$0xff] }
  0x39   :  { %337 = vmatpush.msrb.mxu3 %v162_v20  ;;  %277 = vmatpush.msrb.mxu0 %v97_v21  ;;  %v61_v57 = vld [vmem:[#allocation6 + $0x50] sm:$0xff]  ;;  %v54_v58 = vld [vmem:[#allocation6 + $0x18] sm:$0xff] }
  0x3a   :  { %319 = vmatpush.msrb.mxu2 %v90_v22  ;;  %297 = vmatpush.msrb.mxu1 %v161_v23  ;;  %v125_v59 = vld [vmem:[#allocation6 + $0x250] sm:$0xff]  ;;  %v122_v60 = vld [vmem:[#allocation6 + $0x238] sm:$0xff] }
  0x3b   :  { %338 = vmatpush.msrb.mxu3 %v158_v24  ;;  %278 = vmatpush.msrb.mxu0 %v93_v25  ;;  %v57_v61 = vld [vmem:[#allocation6 + $0x30] sm:$0xff]  ;;  %v118_v0 = vld [vmem:[#allocation6 + $0x218] sm:$0xff] }
  0x3c   :  { %320 = vmatpush.msrb.mxu2 %v86_v26  ;;  %298 = vmatpush.msrb.mxu1 %v157_v27  ;;  %v121_v63 = vld [vmem:[#allocation6 + $0x230] sm:$0xff] }
  0x3d   :  { %339 = vmatpush.msrb.mxu3 %v154_v28  ;;  %279 = vmatpush.msrb.mxu0 %v89_v29  ;;  %v53_v1 = vld [vmem:[#allocation6 + $0x10] sm:$0xff] }
  0x3e   :  { %321 = vmatpush.msrb.mxu2 %v82_v30  ;;  %299 = vmatpush.msrb.mxu1 %v153_v31  ;;  %v117_v3 = vld [vmem:[#allocation6 + $0x210] sm:$0xff] }
  0x3f   :  { %340 = vmatpush.msrb.mxu3 %v150_v32  ;;  %280 = vmatpush.msrb.mxu0 %v85_v33  ;;  %v179_v4 = vld [vmem:[%s547_s4] sm:$0xf] }
  0x40   :  { %322 = vmatpush.msrb.mxu2 %v78_v34  ;;  %300 = vmatpush.msrb.mxu1 %v149_v35  ;;  %v185_v5 = vperm.slane %v179_v4, 0  ;;  %v186_v10 = vperm.slane %v179_v4, 1  ;;  %v187_v26 = vperm.slane %v179_v4, 2  ;;  %v188_v28 = vperm.slane %v179_v4, 3 }
  0x41   :  { %341 = vmatpush.msrb.mxu3 %v146_v36  ;;  %281 = vmatpush.msrb.mxu0 %v81_v37 }
  0x42   :  { %323 = vmatpush.msrb.mxu2 %v74_v38  ;;  %301 = vmatpush.msrb.mxu1 %v145_v39 }
  0x43   :  { %342 = vmatpush.msrb.mxu3 %v142_v40  ;;  %282 = vmatpush.msrb.mxu0 %v77_v41 }
  0x44   :  { %324 = vmatpush.msrb.mxu2 %v70_v42  ;;  %302 = vmatpush.msrb.mxu1 %v141_v43 }
  0x45   :  { %343 = vmatpush.msrb.mxu3 %v138_v44  ;;  %283 = vmatpush.msrb.mxu0 %v73_v45 }
  0x46   :  { %325 = vmatpush.msrb.mxu2 %v66_v46  ;;  %303 = vmatpush.msrb.mxu1 %v137_v47 }
  0x47   :  { %344 = vmatpush.msrb.mxu3 %v134_v48  ;;  %284 = vmatpush.msrb.mxu0 %v69_v49 }
  0x48   :  { %326 = vmatpush.msrb.mxu2 %v62_v50  ;;  %304 = vmatpush.msrb.mxu1 %v133_v51 }
  0x49   :  { %345 = vmatpush.msrb.mxu3 %v130_v52  ;;  %285 = vmatpush.msrb.mxu0 %v65_v53 }
  0x4a   :  { %327 = vmatpush.msrb.mxu2 %v58_v54  ;;  %305 = vmatpush.msrb.mxu1 %v129_v55 }
  0x4b   :  { %346 = vmatpush.msrb.mxu3 %v126_v56  ;;  %286 = vmatpush.msrb.mxu0 %v61_v57 }
  0x4c   :  { %328 = vmatpush.msrb.mxu2 %v54_v58  ;;  %306 = vmatpush.msrb.mxu1 %v125_v59 }
  0x4d   :  { %347 = vmatpush.msrb.mxu3 %v122_v60  ;;  %329 = vmatmul.f32.vlgmr.msrb.gmra.mxu2 %v521_v62 }
  0x4e   :  { %287 = vmatpush.msrb.mxu0 %v57_v61  ;;  %307 = vmatpush.msrb.mxu1 %v121_v63 }
  0x4f   :  { %348 = vmatpush.msrb.mxu3 %v118_v0 }
  0x50   :  { %349 = vmatmul.f32.vlgmr.msrb.gmra.mxu3 %v526_v2  ;;  %288 = vmatpush.msrb.mxu0 %v53_v1 }
  0x51   :  { %289 = vmatmul.f32.vlgmr.msrb.gmra.mxu0 %v521_v62  ;;  %308 = vmatpush.msrb.mxu1 %v117_v3 }
  0x52   :  { %309 = vmatmul.f32.vlgmr.msrb.gmra.mxu1 %v526_v2 }
  0xaa   :  { %v210_v6 = vpop.f32.mrf.mxu0 }
  0xab   :  { %v211_v7 = vadd.f32 %v210_v6, %v185_v5 }
  0xac   :  { %v230_v8 = vpop.f32.mrf.mxu1 }
  0xad   :  { %v231_v9 = vadd.f32 %v230_v8, %v211_v7 }
  0xaf   :  { %v406_v11 = vmul.f32 -1.442695, %v231_v9 }
  0xb0   :  { %v250_v12 = vpop.f32.mrf.mxu2 }
  0xb1   :  { %414 = vpow2.f32 %v406_v11  ;;  %v251_v13 = vadd.f32 %v250_v12, %v186_v10 }
  0xb3   :  { %v270_v14 = vpop.f32.mrf.mxu3 }
  0xb4   :  { %v271_v15 = vadd.f32 %v270_v14, %v251_v13 }
  0xb6   :  { %v407_v62 = vmul.f32 -1.442695, %v271_v15 }
  0xb7   :  { %v415_v16 = vpop.eup %414 }
  0xb8   :  { %v356_v17 = vadd.f32 1.0, %v415_v16  ;;  %416 = vpow2.f32 %v407_v62 }
  0xba   :  { %418 = vrcp.f32 %v356_v17  ;;  %vm362_vm0 = vweird.f32 %v356_v17  ;;  %v368_v31 = vand.u32 2147483648, %v356_v17  ;;  %v366_v34 = vand.u32 2147483647, %v356_v17 }
  0xbc   :  { %v369_v40 = vor.u32 1.1754944e-38, %v368_v31  ;;  %vm367_vm5 = vcmp.eq.f32.partialorder %v366_v34, 8.507059e+37 }
  0xbe   :  { %v417_v18 = vpop.eup %416 }
  0xbf   :  { %v375_v19 = vadd.f32 1.0, %v417_v18 }
  0xc0   :  { %v419_v20 = vpop.eup %418 }
  0xc1   :  { %420 = vrcp.f32 %v375_v19  ;;  %v358_v21 = vmul.f32 %v419_v20, %v356_v17  ;;  %vm363_vm1 = vweird.f32 %v419_v20  ;;  %vm381_vm3 = vweird.f32 %v375_v19 }
  0xc2   :  { %vm364_vm2 = vmor %vm362_vm0, %vm363_vm1  ;;  %v387_v41 = vand.u32 2147483648, %v375_v19  ;;  %v385_v46 = vand.u32 2147483647, %v375_v19 }
  0xc3   :  { %v359_v22 = vsub.f32 1.0, %v358_v21 }
  0xc4   :  { %v388_v48 = vor.u32 1.1754944e-38, %v387_v41  ;;  %vm386_vm7 = vcmp.eq.f32.partialorder %v385_v46, 8.507059e+37 }
  0xc5   :  { %v360_v25 = vmul.f32 %v419_v20, %v359_v22 }
  0xc7   :  { %v421_v23 = vpop.eup %420  ;;  %v361_v30 = vadd.f32 %v419_v20, %v360_v25 }
  0xc8   :  { %v377_v24 = vmul.f32 %v421_v23, %v375_v19  ;;  %vm382_vm4 = vweird.f32 %v421_v23 }
  0xc9   :  { %v365_v38 = vsel %vm364_vm2, %v419_v20, %v361_v30  ;;  %vm383_vm6 = vmor %vm381_vm3, %vm382_vm4 }
  0xca   :  { %v378_v27 = vsub.f32 1.0, %v377_v24  ;;  %v370_v44 = vsel %vm367_vm5, %v369_v40, %v365_v38 }
  0xcc   :  { %v379_v35 = vmul.f32 %v421_v23, %v378_v27 }
  0xce   :  { %v290_v29 = vpop.f32.mrf.mxu0  ;;  %v380_v45 = vadd.f32 %v421_v23, %v379_v35 }
  0xcf   :  { %v291_v33 = vadd.f32 %v290_v29, %v187_v26  ;;  %v310_v37 = vpop.f32.mrf.mxu1 }
  0xd0   :  { %v330_v32 = vpop.f32.mrf.mxu2  ;;  %v384_v50 = vsel %vm383_vm6, %v421_v23, %v380_v45 }
  0xd1   :  { %v331_v36 = vadd.f32 %v330_v32, %v188_v28  ;;  %v311_v43 = vadd.f32 %v310_v37, %v291_v33  ;;  %v389_v51 = vsel %vm386_vm7, %v388_v48, %v384_v50 }
  0xd2   :  { %v394_v52 = vsub.f32 1.0, %v389_v51  ;;  %v396_v55 = vmul.f32 %v389_v51, %v526_v2 }
  0xd3   :  { %v350_v39 = vpop.f32.mrf.mxu3 }
  0xd4   :  { %v351_v42 = vadd.f32 %v350_v39, %v331_v36 }
  0xd6   :  { %v391_v47 = vmul.f32 %v370_v44, %v351_v42 }
  0xd8   :  { %v392_v49 = vadd.f32 %v391_v47, %v311_v43 }
  0xda   :  { %422 = vtanh.f32 %v392_v49 }
  0xe0   :  { %v423_v53 = vpop.eup %422 }
  0xe1   :  { %v395_v54 = vmul.f32 %v423_v53, %v394_v52 }
  0xe3   :  { %v397_v56 = vadd.f32 %v396_v55, %v395_v54 }
  0xe5   :  { %398 = vst [vmem:[%s548_s5] sm:$0x1] %v397_v56 }
  0xe6   :  { %403 = vsyncpa [#allocation5], 1 }
  0xe7   :  { %404 = vsyncpa [#allocation7], 1 }

</bundles_post_ra>
